<compile_context>
chip_gen: v5e
topology: v5e:2x2
jax: 0.10.0
libtpu: 0.0.40
codegen_flags: <defaults>
</compile_context>

<pallas_src>
import functools

import jax
import jax.numpy as jnp
from jax.experimental import pallas as pl
from jax.experimental.pallas import tpu as pltpu

LANES = 128
EPS = 1e-6
_TARGET_BLOCK_BYTES = 2 * 1024 * 1024      # ~2 MiB of each input per grid step
_VMEM_LIMIT_BYTES = 32 * 1024 * 1024


def _cdiv(a, b):
    return -(-a // b)


def _round_up(a, b):
    return _cdiv(a, b) * b


def _tensorcores_per_chip():
    """Best-effort detection: v7x chips have 2 TensorCores sharing HBM."""
    try:
        kind = jax.devices()[0].device_kind.lower()
    except Exception:
        return 1
    return 2 if ("v7" in kind or "7x" in kind) else 1


def _elem_loss(loss_type, diff):
    if loss_type == "Charbonnier":
        # sqrt(y) computed as y * rsqrt(y): rsqrt runs on the (otherwise idle)
        # EUP slot instead of a multi-op VALU sqrt sequence.  y >= EPS^2 > 0.
        y = diff * diff + jnp.float32(EPS * EPS)
        return y * jax.lax.rsqrt(y)
    if loss_type == "L1":
        return jnp.abs(diff)
    # 'L2' and the PyTorch fallback branch both use squared error.
    return diff * diff


def _fold(v):
    """(br, 128) f32 -> (8, 128) partial sums using only cross-vreg VPU adds.

    Four independent accumulation chains expose ILP (a single reshape+sum can
    lower to one long serial vadd chain)."""
    br = v.shape[0]
    if br % 32 == 0 and br >= 64:
        v4 = v.reshape(4, br // 32, 8, LANES)
        p0 = v4[0].sum(axis=0)
        p1 = v4[1].sum(axis=0)
        p2 = v4[2].sum(axis=0)
        p3 = v4[3].sum(axis=0)
        return (p0 + p1) + (p2 + p3)
    return v.reshape(br // 8, 8, LANES).sum(axis=0)


def _mask_tail(val, n_rem):
    """Zero elements whose local flat index >= n_rem.

    Uses a select (not a multiply) so NaN/garbage bits in OOB rows or the lane
    padding can never propagate into the sum."""
    br = val.shape[0]
    row = jax.lax.broadcasted_iota(jnp.int32, (br, LANES), 0)
    col = jax.lax.broadcasted_iota(jnp.int32, (br, LANES), 1)
    flat = row * LANES + col
    return jnp.where(flat < n_rem, val, jnp.float32(0.0))


def _acc_kernel(loss_type, mask_rem, src_ref, tgt_ref, out_ref, acc_ref):
    """Single resident-accumulator variant (single-TensorCore chips: v5e/v6e)."""
    i = pl.program_id(0)
    last = pl.num_programs(0) - 1

    @pl.when(i == 0)
    def _():
        acc_ref[...] = jnp.zeros_like(acc_ref)

    diff = tgt_ref[...].astype(jnp.float32) - src_ref[...].astype(jnp.float32)
    val = _elem_loss(loss_type, diff)

    if mask_rem == 0:
        acc_ref[...] += _fold(val)
    else:
        @pl.when(i < last)
        def _():
            acc_ref[...] += _fold(val)

        @pl.when(i == last)
        def _():
            acc_ref[...] += _fold(_mask_tail(val, mask_rem))

    @pl.when(i == last)
    def _():
        lane_sum = jnp.sum(acc_ref[...], axis=1, keepdims=True)   # (8, 1)
        out_ref[...] = jnp.sum(lane_sum, axis=0, keepdims=True)   # (1, 1)


def _partial_kernel(loss_type, mask_rem, src_ref, tgt_ref, out_ref):
    """Per-block partial-sum variant (multi-TensorCore chips: v7x).

    Each grid step writes its own (8,128) partial slab so the grid axis is
    truly parallel; the tiny slab is summed by the wrapper."""
    diff = tgt_ref[...].astype(jnp.float32) - src_ref[...].astype(jnp.float32)
    val = _elem_loss(loss_type, diff)

    if mask_rem == 0:
        out_ref[...] = _fold(val)
    else:
        i = pl.program_id(0)
        last = pl.num_programs(0) - 1

        @pl.when(i < last)
        def _():
            out_ref[...] = _fold(val)

        @pl.when(i == last)
        def _():
            out_ref[...] = _fold(_mask_tail(val, mask_rem))


def photo_loss(source, target, *, loss_type="Charbonnier", scale=1.0,
               reduction="mean", block_rows=None, multicore=None):
    """JAX/Pallas equivalent of PhotoLoss.forward (returns a scalar loss).

    Mirrors the PyTorch module exactly: `scale` is never applied, and
    `reduction` is only honored in the fallback (unknown loss_type) branch.
    """
    assert source.shape == target.shape, "source/target shape mismatch"
    assert reduction in ("sum", "mean", "none"), "Unknown or invalid reduction"
    n = int(source.size)
    assert n > 0
    del scale  # the PyTorch module never applies it

    if multicore is None:
        multicore = _tensorcores_per_chip() > 1

    src = source.reshape(-1)
    tgt = target.reshape(-1)
    itemsize = jnp.dtype(source.dtype).itemsize

    pad = (-n) % LANES
    if pad:
        # TODO(synk): rare n % 128 != 0 path still pays one jnp.pad copy of both
        # inputs to reach a lane-dense (rows, 128) view; the padded elements are
        # masked out inside the kernel, so no analytic correction is needed.
        src = jnp.pad(src, (0, pad))
        tgt = jnp.pad(tgt, (0, pad))
    rows = (n + pad) // LANES
    src = src.reshape(rows, LANES)
    tgt = tgt.reshape(rows, LANES)

    # Dtype-aware block size: ~2 MiB of each input per grid step (4096 rows for
    # f32, 8192 for bf16, ...), multiple of 32 rows so the 4-way fold applies.
    if block_rows is None:
        br = max(32, (_TARGET_BLOCK_BYTES // (LANES * itemsize)) // 32 * 32)
    else:
        br = max(8, _round_up(int(block_rows), 8))
    br = min(br, _round_up(rows, 8))
    num_blocks = _cdiv(rows, br)

    if multicore:
        # v7x: two TensorCores split the 'parallel' grid axis; make sure the
        # block count is >= 2 (and even when small) so both keep streaming HBM.
        nb = num_blocks
        if nb == 1 and rows > 8:
            nb = 2
        elif nb > 1 and nb % 2 == 1:
            nb += 1
        if nb != num_blocks:
            br = max(8, _round_up(_cdiv(rows, nb), 8))
            num_blocks = _cdiv(rows, br)

    # Valid elements in the final block; garbage OOB rows and lane padding are
    # removed by a flat-index select compiled only into that block.
    n_rem = n - (num_blocks - 1) * br * LANES
    mask_rem = 0 if n_rem == br * LANES else n_rem

    cost = pl.CostEstimate(
        flops=6 * n,
        transcendentals=n if loss_type == "Charbonnier" else 0,
        bytes_accessed=2 * n * itemsize + num_blocks * 8 * LANES * 4,
    )
    compiler_params = pltpu.CompilerParams(
        dimension_semantics=("parallel",) if multicore else ("arbitrary",),
        vmem_limit_bytes=_VMEM_LIMIT_BYTES,
    )
    in_specs = [
        pl.BlockSpec((br, LANES), lambda i: (i, 0)),
        pl.BlockSpec((br, LANES), lambda i: (i, 0)),
    ]

    if multicore:
        kernel = functools.partial(_partial_kernel, loss_type, mask_rem)
        partials = pl.pallas_call(
            kernel,
            out_shape=jax.ShapeDtypeStruct((num_blocks * 8, LANES), jnp.float32),
            grid=(num_blocks,),
            in_specs=in_specs,
            out_specs=pl.BlockSpec((8, LANES), lambda i: (i, 0)),
            compiler_params=compiler_params,
            cost_estimate=cost,
        )(src, tgt)
        total = jnp.sum(partials)
    else:
        kernel = functools.partial(_acc_kernel, loss_type, mask_rem)
        out = pl.pallas_call(
            kernel,
            out_shape=jax.ShapeDtypeStruct((1, 1), jnp.float32),
            grid=(num_blocks,),
            in_specs=in_specs,
            out_specs=pl.BlockSpec((1, 1), lambda i: (0, 0)),
            scratch_shapes=[pltpu.VMEM((8, LANES), jnp.float32)],
            compiler_params=compiler_params,
            cost_estimate=cost,
        )(src, tgt)
        total = out[0, 0]

    if loss_type in ("Charbonnier", "L1", "L2"):
        # These branches in the PyTorch module always mean-reduce.
        return total / jnp.float32(n)

    # Fallback branch: F.mse_loss(source, target, reduction=self.reduction).
    if reduction == "mean":
        return total / jnp.float32(n)
    if reduction == "sum":
        return total
    # TODO(synk): reduction='none' returns an elementwise tensor in PyTorch;
    # only scalar reductions are kerneled here.
    raise NotImplementedError("reduction='none' is not kerneled")


if __name__ == "__main__":
    key = jax.random.PRNGKey(0)
    k1, k2, k3, k4 = jax.random.split(key, 4)

    eps2 = jnp.float32(EPS) ** 2

    # (B, 3, H, W) per the module docstring.
    B, C, H, W = 2, 3, 16, 16
    source = jax.random.normal(k1, (B, C, H, W), dtype=jnp.float32)
    target = jax.random.normal(k2, (B, C, H, W), dtype=jnp.float32)

    # Charbonnier / L1 / L2 with automatic variant selection.
    loss = jax.block_until_ready(photo_loss(source, target, loss_type="Charbonnier"))
    ref = jnp.mean(jnp.sqrt((target - source) ** 2 + eps2))
    assert jnp.allclose(loss, ref, rtol=1e-5, atol=1e-6), (loss, ref)

    l1 = jax.block_until_ready(photo_loss(source, target, loss_type="L1"))
    assert jnp.allclose(l1, jnp.mean(jnp.abs(target - source)), rtol=1e-5)

    l2 = jax.block_until_ready(photo_loss(source, target, loss_type="L2"))
    assert jnp.allclose(l2, jnp.mean((target - source) ** 2), rtol=1e-5)

    # Fallback branch (unknown loss_type) honors reduction.
    mse_sum = jax.block_until_ready(
        photo_loss(source, target, loss_type="other", reduction="sum"))
    assert jnp.allclose(mse_sum, jnp.sum((target - source) ** 2), rtol=1e-5)

    # n % 128 != 0: lane pad + in-kernel flat-index mask; exercise both variants.
    s_odd = jax.random.normal(k3, (2, 3, 15, 15), dtype=jnp.float32)
    t_odd = jax.random.normal(k4, (2, 3, 15, 15), dtype=jnp.float32)
    ref_odd = jnp.mean(jnp.sqrt((t_odd - s_odd) ** 2 + eps2))
    for mc in (False, True):
        loss_odd = jax.block_until_ready(
            photo_loss(s_odd, t_odd, loss_type="Charbonnier", multicore=mc))
        assert jnp.allclose(loss_odd, ref_odd, rtol=1e-5, atol=1e-6), (mc, loss_odd, ref_odd)

    # Multi-block grid with a masked tail block; both variants.
    s_big = jax.random.normal(k1, (2, 3, 64, 64), dtype=jnp.float32)
    t_big = jax.random.normal(k2, (2, 3, 64, 64), dtype=jnp.float32)
    ref_big = jnp.mean((t_big - s_big) ** 2)
    for mc in (False, True):
        l2_big = jax.block_until_ready(
            photo_loss(s_big, t_big, loss_type="L2", block_rows=40, multicore=mc))
        assert jnp.allclose(l2_big, ref_big, rtol=1e-5), (mc, l2_big, ref_big)

    # Exact-fit case (no tail mask compiled in, 4-way fold path); both variants.
    s_fit = jax.random.normal(k3, (2, 3, 16, 128), dtype=jnp.float32)
    t_fit = jax.random.normal(k4, (2, 3, 16, 128), dtype=jnp.float32)
    ref_fit = jnp.mean(jnp.abs(t_fit - s_fit))
    for mc in (False, True):
        l1_fit = jax.block_until_ready(
            photo_loss(s_fit, t_fit, loss_type="L1", multicore=mc))
        assert jnp.allclose(l1_fit, ref_fit, rtol=1e-5), (mc, l1_fit, ref_fit)

    # Native-dtype (bf16) streaming; kernel upcasts to f32 internally.
    s_bf = source.astype(jnp.bfloat16)
    t_bf = target.astype(jnp.bfloat16)
    loss_bf = jax.block_until_ready(photo_loss(s_bf, t_bf, loss_type="Charbonnier"))
    ref_bf = jnp.mean(jnp.sqrt(
        (t_bf.astype(jnp.float32) - s_bf.astype(jnp.float32)) ** 2 + eps2))
    assert jnp.allclose(loss_bf, ref_bf, rtol=1e-4, atol=1e-5), (loss_bf, ref_bf)

    print("KERNEL_OK")
</pallas_src>

<mosaic_0001>
module attributes {stable_mosaic.version = 11 : i64} {
  func.func @_acc_kernel(%arg0: i32, %arg1: memref<16x128xf32, #tpu.memory_space<vmem>>, %arg2: memref<16x128xf32, #tpu.memory_space<vmem>>, %arg3: memref<1x1xf32, #tpu.memory_space<vmem>>, %arg4: memref<8x128xf32, #tpu.memory_space<vmem>>) attributes {dimension_semantics = [#tpu.dimension_semantics<arbitrary>], iteration_bounds = array<i64: 1>, scalar_prefetch = 0 : i64, scratch_operands = 1 : i64, tpu.core_type = #tpu.core_type<tc>, window_params = [{transform_indices = @transform_0, window_bounds = array<i64: 16, 128>}, {transform_indices = @transform_1, window_bounds = array<i64: 16, 128>}, {pipeline_mode = #tpu.pipeline_mode<synchronous>, transform_indices = @transform_2, window_bounds = array<i64: 1, 1>}]} {
    %c0_i32 = arith.constant 0 : i32
    %0 = arith.cmpi eq, %arg0, %c0_i32 : i32
    %1 = arith.extui %0 : i1 to i32
    %c0_i32_0 = arith.constant 0 : i32
    %2 = arith.cmpi ne, %1, %c0_i32_0 : i32
    scf.if %2 {
      %cst_10 = arith.constant 0.000000e+00 : f32
      %20 = vector.broadcast %cst_10 : f32 to vector<8x128xf32>
      %c0_11 = arith.constant 0 : index
      %c0_12 = arith.constant 0 : index
      %21 = vector.load %arg4[%c0_11, %c0_12] : memref<8x128xf32, #tpu.memory_space<vmem>>, vector<8x128xf32>
      tpu.vector_store %arg4[%c0_11, %c0_12], %20 {strides = array<i32>} : memref<8x128xf32, #tpu.memory_space<vmem>>, vector<8x128xf32>,
    } else {
    }
    %c0 = arith.constant 0 : index
    %c0_1 = arith.constant 0 : index
    %3 = vector.load %arg2[%c0, %c0_1] : memref<16x128xf32, #tpu.memory_space<vmem>>, vector<16x128xf32>
    %c0_2 = arith.constant 0 : index
    %c0_3 = arith.constant 0 : index
    %4 = vector.load %arg1[%c0_2, %c0_3] : memref<16x128xf32, #tpu.memory_space<vmem>>, vector<16x128xf32>
    %5 = arith.subf %3, %4 : vector<16x128xf32>
    %6 = arith.mulf %5, %5 : vector<16x128xf32>
    %cst = arith.constant 9.99999996E-13 : f32
    %7 = vector.broadcast %cst : f32 to vector<16x128xf32>
    %8 = arith.addf %6, %7 : vector<16x128xf32>
    %9 = math.rsqrt %8 : vector<16x128xf32>
    %10 = arith.mulf %8, %9 : vector<16x128xf32>
    %c0_i32_4 = arith.constant 0 : i32
    %11 = arith.cmpi slt, %arg0, %c0_i32_4 : i32
    %12 = arith.extui %11 : i1 to i32
    %c0_i32_5 = arith.constant 0 : i32
    %13 = arith.cmpi ne, %12, %c0_i32_5 : i32
    scf.if %13 {
      %c0_10 = arith.constant 0 : index
      %c0_11 = arith.constant 0 : index
      %20 = vector.load %arg4[%c0_10, %c0_11] : memref<8x128xf32, #tpu.memory_space<vmem>>, vector<8x128xf32>
      %21 = vector.shape_cast %10 : vector<16x128xf32> to vector<2x8x128xf32>
      %cst_12 = arith.constant dense<0.000000e+00> : vector<8x128xf32>
      %22 = vector.multi_reduction <add>, %21, %cst_12 [0] : vector<2x8x128xf32> to vector<8x128xf32>
      %23 = arith.addf %20, %22 : vector<8x128xf32>
      %c0_13 = arith.constant 0 : index
      %c0_14 = arith.constant 0 : index
      %24 = vector.load %arg4[%c0_13, %c0_14] : memref<8x128xf32, #tpu.memory_space<vmem>>, vector<8x128xf32>
      tpu.vector_store %arg4[%c0_13, %c0_14], %23 {strides = array<i32>} : memref<8x128xf32, #tpu.memory_space<vmem>>, vector<8x128xf32>,
    } else {
    }
    %c0_i32_6 = arith.constant 0 : i32
    %14 = arith.cmpi eq, %arg0, %c0_i32_6 : i32
    %15 = arith.extui %14 : i1 to i32
    %c0_i32_7 = arith.constant 0 : i32
    %16 = arith.cmpi ne, %15, %c0_i32_7 : i32
    scf.if %16 {
      %c0_10 = arith.constant 0 : index
      %c0_11 = arith.constant 0 : index
      %20 = vector.load %arg4[%c0_10, %c0_11] : memref<8x128xf32, #tpu.memory_space<vmem>>, vector<8x128xf32>
      %21 = tpu.iota {dimensions = array<i32: 0>} : vector<16x128xi32>
      %22 = tpu.iota {dimensions = array<i32: 1>} : vector<16x128xi32>
      %c128_i32 = arith.constant 128 : i32
      %23 = vector.broadcast %c128_i32 : i32 to vector<16x128xi32>
      %24 = arith.muli %21, %23 : vector<16x128xi32>
      %25 = arith.addi %24, %22 : vector<16x128xi32>
      %c1536_i32 = arith.constant 1536 : i32
      %26 = vector.broadcast %c1536_i32 : i32 to vector<16x128xi32>
      %27 = arith.cmpi slt, %25, %26 : vector<16x128xi32>
      %cst_12 = arith.constant 0.000000e+00 : f32
      %28 = vector.broadcast %cst_12 : f32 to vector<16x128xf32>
      %29 = arith.select %27, %10, %28 : vector<16x128xi1>, vector<16x128xf32>
      %30 = vector.shape_cast %29 : vector<16x128xf32> to vector<2x8x128xf32>
      %cst_13 = arith.constant dense<0.000000e+00> : vector<8x128xf32>
      %31 = vector.multi_reduction <add>, %30, %cst_13 [0] : vector<2x8x128xf32> to vector<8x128xf32>
      %32 = arith.addf %20, %31 : vector<8x128xf32>
      %c0_14 = arith.constant 0 : index
      %c0_15 = arith.constant 0 : index
      %33 = vector.load %arg4[%c0_14, %c0_15] : memref<8x128xf32, #tpu.memory_space<vmem>>, vector<8x128xf32>
      tpu.vector_store %arg4[%c0_14, %c0_15], %32 {strides = array<i32>} : memref<8x128xf32, #tpu.memory_space<vmem>>, vector<8x128xf32>,
    } else {
    }
    %c0_i32_8 = arith.constant 0 : i32
    %17 = arith.cmpi eq, %arg0, %c0_i32_8 : i32
    %18 = arith.extui %17 : i1 to i32
    %c0_i32_9 = arith.constant 0 : i32
    %19 = arith.cmpi ne, %18, %c0_i32_9 : i32
    scf.if %19 {
      %c0_10 = arith.constant 0 : index
      %c0_11 = arith.constant 0 : index
      %20 = vector.load %arg4[%c0_10, %c0_11] : memref<8x128xf32, #tpu.memory_space<vmem>>, vector<8x128xf32>
      %cst_12 = arith.constant dense<0.000000e+00> : vector<8xf32>
      %21 = vector.multi_reduction <add>, %20, %cst_12 [1] : vector<8x128xf32> to vector<8xf32>
      %22 = vector.shape_cast %21 : vector<8xf32> to vector<8x1xf32>
      %cst_13 = arith.constant dense<0.000000e+00> : vector<1xf32>
      %23 = vector.multi_reduction <add>, %22, %cst_13 [0] : vector<8x1xf32> to vector<1xf32>
      %24 = vector.shape_cast %23 : vector<1xf32> to vector<1x1xf32>
      %c0_14 = arith.constant 0 : index
      %c0_15 = arith.constant 0 : index
      %25 = vector.load %arg3[%c0_14, %c0_15] : memref<1x1xf32, #tpu.memory_space<vmem>>, vector<1x1xf32>
      tpu.vector_store %arg3[%c0_14, %c0_15], %24 {strides = array<i32>} : memref<1x1xf32, #tpu.memory_space<vmem>>, vector<1x1xf32>,
    } else {
    }
    return
  }
  func.func @transform_0(%arg0: i32) -> (i32, i32) {
    %c0_i32 = arith.constant 0 : i32
    %c0_i32_0 = arith.constant 0 : i32
    return %arg0, %c0_i32 : i32, i32
  }
  func.func @transform_1(%arg0: i32) -> (i32, i32) {
    %c0_i32 = arith.constant 0 : i32
    %c0_i32_0 = arith.constant 0 : i32
    return %arg0, %c0_i32 : i32, i32
  }
  func.func @transform_2(%arg0: i32) -> (i32, i32) {
    %c0_i32 = arith.constant 0 : i32
    %c0_i32_0 = arith.constant 0 : i32
    %c0_i32_1 = arith.constant 0 : i32
    return %c0_i32, %c0_i32_0 : i32, i32
  }
}

</mosaic_0001>

<bundles_post_ra>
// kernel: tpu_custom_call.1
= control target key start
LH: loop header
LB: loop body
LE: loop exit
PB: predicated region body
PF: predicated region fallthrough
CT: control target
= control target key end

     0   :  { %7 = vsyncpa [#allocation4], 0  ;;  %s254_s0 = inlined_call_operand.hbm [shape: f32[12,128], index: 0, kind: input, shape index: {}]   ;;  %s255_s1 = inlined_call_operand.hbm [shape: f32[12,128], index: 1, kind: input, shape index: {}]   ;;  %s256_s2 = inlined_call_operand.hbm [shape: f32[1,1], index: 2, kind: output, shape index: {}]  }
   0x1   :  { %8 = vsyncpa [#allocation7], 0 }
   0x2   :  { %9 = vsyncpa [#allocation5], 0  ;;  %s14_s11 = sshll.u32 %s254_s0, 4  ;;  %s225_s12 = smov [#allocation3]   ;;  %s15_s11 = int_to_ptr.hbm [resolvable:$true] %s14_s11 }
   0x3   :  { %s16_s13 = sshll.u32 %s225_s12, 4  ;;  %s27_s16 = sshll.u32 %s255_s1, 4  ;;  %s17_s13 = int_to_ptr.vmem [resolvable:$true] %s16_s13  ;;  %s28_s16 = int_to_ptr.hbm [resolvable:$true] %s27_s16 }
   0x4   :  { %s226_s17 = smov 128   ;;  %s227_s18 = smov 8  }
   0x5   :  { %22 = dma.hbm_to_vmem [thread:$0]  %s15_s11, 256, %s17_s13, [#allocation4], %s226_s17, %s226_s17, %s227_s18  }
   0x6   :  { %s228_s19 = smov [#allocation6]  }
   0x7   :  { %s29_s20 = sshll.u32 %s228_s19, 4  ;;  %s30_s20 = int_to_ptr.vmem [resolvable:$true] %s29_s20 }
   0x8   :  { %35 = dma.hbm_to_vmem [thread:$0]  %s28_s16, 256, %s30_s20, [#allocation7], %s226_s17, %s226_s17, %s227_s18  }
   0x9   :  { %219 = dma.done.wait [#allocation4], 256  }
   0xa   :  { %220 = vsyncadd [#allocation4], 4294967040 }
   0xb   :  { %221 = dma.done.wait [#allocation7], 256  }
   0xc   :  { %222 = vsyncadd [#allocation7], 4294967040  ;;  %v49_v0 = vld [vmem:[#allocation6] sm:$0xff]  ;;  %v50_v1 = vld [vmem:[#allocation6 + $0x8] sm:$0xff]  ;;  %v93_v9 = vlaneseq  ;;  %s229_s0 = smov [#allocation8]   ;;  %s127_s23 = sshll.u32 %s256_s2, 4  ;;  %s128_s23 = int_to_ptr.hbm [resolvable:$true] %s127_s23 }
   0xd   :  { %v51_v2 = vld [vmem:[#allocation3] sm:$0xff]  ;;  %v52_v3 = vld [vmem:[#allocation3 + $0x8] sm:$0xff]  ;;  %s125_s1 = sshll.u32 %s229_s0, 4  ;;  %vm118_vm8 = vcmask 0   ;;  %s126_s1 = int_to_ptr.vmem [resolvable:$true] %s125_s1 }
   0xe   :  { %v53_v4 = vsub.f32 %v49_v0, %v51_v2  ;;  %v54_v5 = vsub.f32 %v50_v1, %v52_v3  ;;  %v94_v11 = vshrl.u32 %v93_v9, 7  ;;  %v97_v18 = vand.u32 127, %v93_v9 }
  0x10   :  { %v55_v6 = vmul.f32 %v53_v4, %v53_v4  ;;  %v56_v7 = vmul.f32 %v54_v5, %v54_v5  ;;  %v95_v13 = vadd.s32 8, %v94_v11  ;;  %v98_v19 = vmul.u32 128, %v94_v11 }
  0x12   :  { %v57_v8 = vadd.f32 1e-12, %v55_v6  ;;  %v58_v10 = vadd.f32 1e-12, %v56_v7  ;;  %v99_v21 = vmul.u32 128, %v95_v13  ;;  %v100_v25 = vadd.s32 %v98_v19, %v97_v18 }
  0x14   :  { %143 = vrsqrt.f32 %v57_v8  ;;  %vm65_vm0 = vweird.f32 %v57_v8  ;;  %vm75_vm2 = vweird.f32 %v58_v10  ;;  %v101_v27 = vadd.s32 %v99_v21, %v97_v18 }
  0x15   :  { %145 = vrsqrt.f32 %v58_v10  ;;  %vm102_vm6 = vcmp.lt.s32.totalorder %v100_v25, 1536 }
  0x16   :  { %vm103_vm7 = vcmp.lt.s32.totalorder %v101_v27, 1536 }
  0x1a   :  { %v144_v12 = vpop.eup %143 }
  0x1b   :  { %v146_v14 = vpop.eup %145  ;;  %v60_v15 = vmul.f32 %v144_v12, %v57_v8  ;;  %vm66_vm1 = vweird.f32 %v144_v12 }
  0x1c   :  { %v70_v16 = vmul.f32 %v146_v14, %v58_v10  ;;  %vm76_vm3 = vweird.f32 %v146_v14  ;;  %vm67_vm4 = vmor %vm65_vm0, %vm66_vm1 }
  0x1d   :  { %v61_v17 = vmul.f32 %v144_v12, %v60_v15  ;;  %vm77_vm5 = vmor %vm75_vm2, %vm76_vm3 }
  0x1e   :  { %v71_v20 = vmul.f32 %v146_v14, %v70_v16 }
  0x1f   :  { %v62_v22 = vmul.f32 0.5, %v61_v17 }
  0x20   :  { %v72_v23 = vmul.f32 0.5, %v71_v20 }
  0x21   :  { %v63_v24 = vsub.f32 1.5, %v62_v22 }
  0x22   :  { %v73_v26 = vsub.f32 1.5, %v72_v23 }
  0x23   :  { %v64_v28 = vmul.f32 %v144_v12, %v63_v24 }
  0x24   :  { %v74_v29 = vmul.f32 %v146_v14, %v73_v26 }
  0x25   :  { %v68_v30 = vsel %vm67_vm4, %v144_v12, %v64_v28 }
  0x26   :  { %v78_v31 = vsel %vm77_vm5, %v146_v14, %v74_v29  ;;  %v79_v32 = vmul.f32 %v68_v30, %v57_v8 }
  0x27   :  { %v80_v33 = vmul.f32 %v78_v31, %v58_v10 }
  0x28   :  { %v104_v34 = vsel %vm102_vm6, %v79_v32, 0.0 }
  0x29   :  { %v105_v35 = vsel %vm103_vm7, %v80_v33, 0.0 }
  0x2a   :  { %v106_v36 = vadd.f32 %v105_v35, %v104_v34 }
  0x2c   :  { %110 = vadd.xlane.f32.xlu0 %v106_v36 }
  0x9f   :  { %v111_v37 = vpop.xlane.xlu0 %110 }
  0xa0   :  { %v112_v38 = vrot.slane %v111_v37, 4 }
  0xa2   :  { %v113_v39 = vadd.f32 %v112_v38, %v111_v37 }
  0xa4   :  { %v114_v40 = vrot.slane %v113_v39, 2 }
  0xa6   :  { %v115_v41 = vadd.f32 %v114_v40, %v113_v39 }
  0xa8   :  { %v116_v42 = vrot.slane %v115_v41, 1 }
  0xaa   :  { %v117_v43 = vadd.f32 %v116_v42, %v115_v41 }
  0xac   :  { %119 = vst.msk [vmem:[#allocation8] sm:$0x1] %vm118_vm8, %v117_v43 }
  0xad   :  { %130 = dma.vmem_to_hbm [thread:$0]  %s126_s1, 16, %s128_s23, [#allocation5]  }
  0xae   :  { %223 = dma.done.wait [#allocation5], 16  }
  0xaf   :  { %224 = vsyncadd [#allocation5], 4294967280 }
  0xb0   :  { %135 = vsyncpa [#allocation4], 1 }
  0xb1   :  { %136 = vsyncpa [#allocation7], 1 }
  0xb2   :  { %137 = vsyncpa [#allocation5], 1 }

</bundles_post_ra>
